<compile_context>
chip_gen: v5e
topology: v5e:2x2
jax: 0.10.0
libtpu: 0.0.40
codegen_flags: <defaults>
</compile_context>

<pallas_src>
import functools

import jax
import jax.numpy as jnp
from jax.experimental import pallas as pl
from jax.experimental.pallas import tpu as pltpu


def _cdiv(a, b):
    return -(-a // b)


def _permute_block_kernel(squeeze_shape, block_perm, out_block_shape, x_ref, o_ref):
    x = x_ref[...]
    if squeeze_shape != x.shape:
        x = x.reshape(squeeze_shape)           # drop unit (gridded) axes: free reshape
    if block_perm != tuple(range(len(block_perm))):
        x = jnp.transpose(x, block_perm)       # in-VMEM (XLU) transpose
    o_ref[...] = x.reshape(out_block_shape)    # re-insert unit axes: free reshape


def _pick_tile(extent, mult, limit):
    """Largest legal tile: the full extent, or a multiple of `mult` that is <= limit."""
    if extent <= limit or extent <= mult:
        return extent
    t = max(mult, (limit // mult) * mult)
    for cand in range(t, mult - 1, -mult):     # prefer an even divisor (no masked edges)
        if extent % cand == 0:
            return cand
    return t


def permute(x, dims, *, target_block_bytes=None, min_block_bytes=512 * 1024):
    """Pallas TPU equivalent of torch.Tensor.permute(*dims) (forward only)."""
    n = x.ndim
    dims = tuple(int(d) % n for d in dims)
    if sorted(dims) != list(range(n)):
        raise ValueError(f"invalid permutation {dims} for rank {n}")
    if n < 2 or dims == tuple(range(n)):
        return x                               # identity / 0-,1-D permute is a no-op

    shape = tuple(x.shape)
    out_shape = tuple(shape[d] for d in dims)
    itemsize = jnp.dtype(x.dtype).itemsize

    a, b = dims[-2], dims[-1]                  # input dims that become output (sublane, lane)
    lane_dims = {n - 1, b}
    sublane_dims = {n - 2, a} - lane_dims
    sub_mult = max(8, (32 // (8 * itemsize)) * 8)   # 8 f32 / 16 bf16 / 32 int8

    def dim_mult(k):
        if k in lane_dims:
            return 128
        if k in sublane_dims:
            return sub_mult
        return 1

    carried = {n - 2, n - 1, a, b}

    # ---- per-generation VMEM budget -------------------------------------------------
    vmem_cap = 64 << 20                        # assume the smallest (v7x per-TC VMEM)
    try:
        vmem_cap = int(getattr(pltpu.get_tpu_info(), "vmem_capacity_bytes", vmem_cap))
    except Exception:
        pass
    if target_block_bytes is None:
        target_block_bytes = (4 << 20) if vmem_cap >= (128 << 20) else (2 << 20)
    target_elems = max(1, target_block_bytes // itemsize)

    # ---- tile the carried (minor) dims; the OUTPUT lane dim gets the budget first ---
    tiles = [1] * n
    prio = []
    for k in (b, n - 1, a, n - 2):
        if k not in prio:
            prio.append(k)
    SWEET = 512                                # measured ~85% of HBM roofline at 512-wide
    remaining = target_elems
    for k in prio:
        tiles[k] = _pick_tile(shape[k], dim_mult(k), min(shape[k], SWEET, remaining))
        remaining = max(1, remaining // max(tiles[k], 1))

    def block_elems():
        e = 1
        for t in tiles:
            e *= t
        return e

    def block_perm_of(kept_set):
        kept_sorted = [k for k in range(n) if k in kept_set]
        out_order = [d for d in dims if d in kept_set]
        return tuple(kept_sorted.index(d) for d in out_order)

    def identity_perm(kept_set):
        p = block_perm_of(kept_set)
        return p == tuple(range(len(p)))

    # ---- coalesce leading axes, but only for pure-copy blocks (keeps the in-block
    #      transpose <= 2-D after squeezing; no risky Mosaic N-D relayouts) -----------
    outpos = {k: dims.index(k) for k in range(n)}
    kept = {k for k in range(n) if tiles[k] > 1}
    if identity_perm(kept):
        for k in sorted((k for k in range(n) if k not in carried),
                        key=lambda k: -outpos[k]):          # innermost output dim first
            if block_elems() * itemsize >= min_block_bytes:
                break
            if not identity_perm(kept | {k}):
                continue
            need = _cdiv(min_block_bytes // itemsize, max(block_elems(), 1))
            t = min(shape[k], need)
            if shape[k] % t and shape[k] * block_elems() * itemsize <= 2 * min_block_bytes:
                t = shape[k]                                 # full extent: no masked edge
            tiles[k] = t
            if t > 1:
                kept.add(k)

    # ---- guarantee >= 2 grid steps so both TensorCores (v7x) get work ----------------
    def grid_size():
        g = 1
        for k in range(n):
            g *= _cdiv(shape[k], tiles[k])
        return g

    if grid_size() < 2:
        cands = []
        for k in range(n):
            m = dim_mult(k)
            if shape[k] >= 2 and shape[k] >= 2 * m:
                # prefer splitting unconstrained dims, then anything but the output lane dim
                cands.append((0 if m == 1 else (1 if k != b else 2), -shape[k], k))
        if cands:
            cands.sort()
            k = cands[0][2]
            m, ext = dim_mult(k), shape[k]
            t = max(m, ((ext // 2) // m) * m)
            while t > m and ext % t:                          # prefer an even divisor
                t -= m
            tiles[k] = t

    # ---- grid / BlockSpecs -----------------------------------------------------------
    gridded = sorted((k for k in range(n) if _cdiv(shape[k], tiles[k]) > 1),
                     key=lambda k: outpos[k])                 # innermost output dim fastest
    grid = tuple(_cdiv(shape[k], tiles[k]) for k in gridded) or (1,)
    pos = {k: i for i, k in enumerate(gridded)}

    in_block = tuple(tiles[k] for k in range(n))
    out_block = tuple(tiles[dims[j]] for j in range(n))

    def in_index_map(*g):
        return tuple(g[pos[k]] if k in pos else 0 for k in range(n))

    def out_index_map(*g):
        return tuple(g[pos[dims[j]]] if dims[j] in pos else 0 for j in range(n))

    kept = [k for k in range(n) if tiles[k] > 1]
    if kept:
        squeeze_shape = tuple(tiles[k] for k in kept)
        block_perm = tuple(kept.index(d) for d in dims if d in kept)
    else:
        squeeze_shape, block_perm = in_block, tuple(range(n))
    # TODO(synk): permutations whose squeezed in-block transpose is >2-D (e.g. dims like
    # (2,3,0,1)) rely on Mosaic's general relayout lowering; the model's permutes
    # ((B,L,C)<->(B,C,L), last-two-dim swaps, batch reorders) never hit that path.

    block_bytes = block_elems() * itemsize
    vmem_limit = int(min(max(32 << 20, 8 * block_bytes + (8 << 20)),
                         (vmem_cap * 3) // 4))

    kernel = functools.partial(_permute_block_kernel, squeeze_shape, block_perm,
                               out_block)
    return pl.pallas_call(
        kernel,
        out_shape=jax.ShapeDtypeStruct(out_shape, x.dtype),
        grid=grid,
        in_specs=[pl.BlockSpec(in_block, in_index_map)],
        out_specs=pl.BlockSpec(out_block, out_index_map),
        compiler_params=pltpu.CompilerParams(
            dimension_semantics=("parallel",) * len(grid),
            vmem_limit_bytes=vmem_limit),
        cost_estimate=pl.CostEstimate(flops=0, transcendentals=0,
                                      bytes_accessed=2 * x.size * itemsize),
    )(x)


class Permute:
    """Mirror of the PyTorch nn.Module: Permute(*dims)(x) == x.permute(*dims)."""

    def __init__(self, *dims):
        self.dims = dims

    def __call__(self, x):
        return permute(x, self.dims)


if __name__ == "__main__":
    key = jax.random.PRNGKey(0)

    # Typical uses in the model: (B, L, C) <-> (B, C, L) around Conv1d, last-two-dim
    # swaps, batch-axis reorders; plus two cases that exercise the tiling / splitter.
    cases = [
        ((2, 8, 32), (0, 2, 1)),
        ((2, 4, 16, 128), (0, 1, 3, 2)),
        ((3, 2, 16, 128), (1, 0, 2, 3)),
        ((256, 512), (1, 0)),          # exercises the >=2-grid-point splitter
        ((4, 1024, 512), (0, 2, 1)),   # exercises 512-wide minor-dim tiling
    ]
    keys = jax.random.split(key, len(cases))
    for (shape, dims), k in zip(cases, keys):
        x = jax.random.normal(k, shape, dtype=jnp.float32)
        out = jax.block_until_ready(Permute(*dims)(x))
        ref = jnp.transpose(x, dims)
        assert out.shape == ref.shape, (out.shape, ref.shape)
        assert bool(jnp.array_equal(out, ref)), f"mismatch for {shape} permute{dims}"

    print("KERNEL_OK")
</pallas_src>

<mosaic_0001>
module attributes {stable_mosaic.version = 11 : i64} {
  func.func @_permute_block_kernel(%arg0: i32, %arg1: memref<1x8x32xf32, #tpu.memory_space<vmem>>, %arg2: memref<1x32x8xf32, #tpu.memory_space<vmem>>) attributes {dimension_semantics = [#tpu.dimension_semantics<parallel>], iteration_bounds = array<i64: 2>, scalar_prefetch = 0 : i64, scratch_operands = 0 : i64, tpu.core_type = #tpu.core_type<tc>, window_params = [{transform_indices = @transform_0, window_bounds = array<i64: 1, 8, 32>}, {transform_indices = @transform_1, window_bounds = array<i64: 1, 32, 8>}]} {
    %c0 = arith.constant 0 : index
    %c0_0 = arith.constant 0 : index
    %c0_1 = arith.constant 0 : index
    %0 = vector.load %arg1[%c0, %c0_0, %c0_1] : memref<1x8x32xf32, #tpu.memory_space<vmem>>, vector<1x8x32xf32>
    %1 = vector.shape_cast %0 : vector<1x8x32xf32> to vector<8x32xf32>
    %2 = tpu.transpose %1, [1, 0] : vector<8x32xf32> -> vector<32x8xf32>
    %3 = vector.shape_cast %2 : vector<32x8xf32> to vector<1x32x8xf32>
    %c0_2 = arith.constant 0 : index
    %c0_3 = arith.constant 0 : index
    %c0_4 = arith.constant 0 : index
    %4 = vector.load %arg2[%c0_2, %c0_3, %c0_4] : memref<1x32x8xf32, #tpu.memory_space<vmem>>, vector<1x32x8xf32>
    tpu.vector_store %arg2[%c0_2, %c0_3, %c0_4], %3 {strides = array<i32>} : memref<1x32x8xf32, #tpu.memory_space<vmem>>, vector<1x32x8xf32>,
    return
  }
  func.func @transform_0(%arg0: i32) -> (i32, i32, i32) {
    %c0_i32 = arith.constant 0 : i32
    %c0_i32_0 = arith.constant 0 : i32
    %c0_i32_1 = arith.constant 0 : i32
    return %arg0, %c0_i32, %c0_i32_0 : i32, i32, i32
  }
  func.func @transform_1(%arg0: i32) -> (i32, i32, i32) {
    %c0_i32 = arith.constant 0 : i32
    %c0_i32_0 = arith.constant 0 : i32
    %c0_i32_1 = arith.constant 0 : i32
    return %arg0, %c0_i32, %c0_i32_0 : i32, i32, i32
  }
}

</mosaic_0001>

<bundles_post_ra>
// kernel: tpu_custom_call.1
= control target key start
LH: loop header
LB: loop body
LE: loop exit
PB: predicated region body
PF: predicated region fallthrough
CT: control target
= control target key end

     0   :  { %6 = vsyncpa [#allocation3], 0  ;;  %s463_s0 = inlined_call_operand.hbm [shape: f32[2,8,32], index: 0, kind: input, shape index: {}]   ;;  %s464_s1 = inlined_call_operand.vmem [shape: f32[2,32,8], index: 1, kind: output, shape index: {}]  }
   0x1   :  { %8 = vsyncpa [#allocation3 + $0x1], 0  ;;  %s369_s6 = smov 0   ;;  %s371_s7 = smov 0  }
   0x2   :  { %s373_s8 = smov 0   ;;  %s375_s9 = smov 0  }
   0x3 LB: > { %s388_s10 = sadd.s32 4294967295, %s357_s9   ;;  %s391_s11 = sadd.s32 1, %s357_s9   ;;  %s357_s9 = sphi %s375_s9, %s471_s9   ;;  %s353_s8 = sphi %s373_s8, %s470_s8   ;;  %s349_s7 = sphi %s371_s7, %s469_s7   ;;  %s345_s6 = sphi %s369_s6, %s468_s6  }
   0x4   : > { %s18_s12 = ssub.s32 %s357_s9, %s391_s11  ;;  %s21_s13 = sadd.s32 1, %s353_s8 }
   0x5   : > { %p19_p0 = scmp.eq.s32.totalorder %s18_s12, 0  ;;  %p28_p1 = scmp.ne.s32.totalorder %s353_s8, %s349_s7 }
   0x6   : > { %p29_p2 = scmp.eq.s32.totalorder %s357_s9, 0  ;;  %p34_p3 = scmp.ne.s32.totalorder %s349_s7, %s345_s6 }
   0x7   : > { %s401_s14 = scalar_select %p19_p0, %s353_s8, %s21_s13  }
   0x8   : > { %p403_p4 = por %p29_p2, %p28_p1  ;;  %p35_p5 = scmp.eq.s32.totalorder %s388_s10, 0 }
   0x9   : > { %p259_p6 = scmp.lt.s32.totalorder %s357_s9, 2  ;;  %s84_s17 = sand.u32 1, %s353_s8  }
   0xa   : > { %p409_p7 = por %p35_p5, %p34_p3  ;;  %s244_s18 = sshll.u32 %s84_s17, 3 }
   0xb   : > { %s245_s19 = sshll.u32 %s357_s9, 3  ;;  %s88_s23 = scalar_lea.vmem [#allocation2], %s244_s18 }
   0xc   : > { %s92_s22 = scalar_lea.hbm %s463_s0, %s245_s19  ;;  %s96_s24 = sshll.u32 %s88_s23, 4  ;;  %s97_s24 = int_to_ptr.vmem [resolvable:$true] %s96_s24 }
   0xd   : > { %s94_s25 = sshll.u32 %s92_s22, 4  ;;  %p420_p8 = pnand %p259_p6, %p403_p4  ;;  %s95_s25 = int_to_ptr.hbm [resolvable:$true] %s94_s25 }
   0xe   : > { %p246_p9 = scmp.ge.s32.totalorder %s357_s9, 1  ;;  %p101_p10 = scmp.lt.s32.totalorder %s357_s9, 3 }
   0xf   : > { %s85_s27 = scalar_lea.sflag [#allocation3], %s84_s17  ;;  %s293_s28 = sshra.s32 %s95_s25, 4  ;;  %s294_s28 = int_to_ptr.hbm [resolvable:$true] %s293_s28 }
  0x10   : > { %s295_s29 = scalar_lea.hbm %s294_s28, 8  ;;  %p297_p12 = pneg %p420_p8 }
  0x11   : > { %p296_p11 = scmp.ne.s32.totalorder %s294_s28, %s295_s29  ;;  %s300_s3 = scalar_lea.hbm %s463_s0, 16 }
  0x12   : > { %p301_p1 = scmp.lt.s32.totalorder %s294_s28, %s463_s0  ;;  %p302_p2 = scmp.lt.s32.totalorder %s300_s3, %s295_s29 }
  0x13   : > { %p298_p13 = pnand %p297_p12, %p296_p11 }
  0x14   : > { %p303_p3 = por %p302_p2, %p301_p1 }
  0x15   : > { %p299_p0 = pneg %p298_p13 }
  0x17   : > { %p304_p4 = pnand %p303_p3, %p299_p0 }
  0x19   : > { %307 = shalt.err (!%p304_p4)
}
  0x1a   : > { %258 = dma.hbm_to_vmem [thread:$0]  (!%p420_p8), %s95_s25, 128, %s97_s24, %s85_s27  }
  0x1b   : > { %p102_p5 = pnand %p246_p9, %p101_p10 }
  0x1c   : > { %s107_s6 = sand.u32 (!%p102_p5), 1, %s349_s7  }
  0x1d   : > { %105 = sbr.rel (%p102_p5) target bundleno = 226 (0xe2), region = 24  ;;  %s247_s12 = sshll.u32 (!%p102_p5), %s107_s6, 3 }
  0x1e   : > { %s108_s13 = scalar_lea.sflag (!%p102_p5), [#allocation3], %s107_s6  ;;  %s111_s15 = scalar_lea.vmem (!%p102_p5), [#allocation2], %s247_s12 }
  0x22   : > { %340 = dma.done.wait (%p409_p7), %s108_s13, 128  }
  0x23   : > { %342 = vsyncadd (%p409_p7), %s108_s13, 4294967168  ;;  %v136_v0 = vld [vmem:[%s111_s15] sm:$0xff]  ;;  %p131_p6 = scmp.lt.s32.totalorder %s388_s10, 1  ;;  %vm169_vm0 = vcmask 64512  }
  0x24   : > { %137 = vxpose.xlu0.b32.start.end [1/1] (short) (narrow) %v136_v0, 32 }
  0x25   : > { %s473_s10 = smov (!%p131_p6, %s388_s10), 1 }
  0x26   : > { %s252_s9 = sshll.u32 %s473_s10, 5 }
  0x27   : > { %s135_s19 = scalar_lea.vmem %s464_s1, %s252_s9 }
  0xc8   : > { %v153_v1 = vpop.trf.xlu0 }
  0xc9   : > { %170 = vst.msk [vmem:[%s135_s19] sm:$0xff] %vm169_vm0, %v153_v1 }
  0xd0   : > { %v154_v2 = vpop.trf.xlu0 }
  0xd1   : > { %171 = vst.msk [vmem:[%s135_s19 + $0x8] sm:$0xff] %vm169_vm0, %v154_v2 }
  0xd8   : > { %v155_v3 = vpop.trf.xlu0 }
  0xd9   : > { %172 = vst.msk [vmem:[%s135_s19 + $0x10] sm:$0xff] %vm169_vm0, %v155_v3 }
  0xe0   : > { %v156_v4 = vpop.trf.xlu0 }
  0xe1   : > { %173 = vst.msk [vmem:[%s135_s19 + $0x18] sm:$0xff] %vm169_vm0, %v156_v4 }
  0xe2 PF: > { %p11_p7 = scmp.ge.s32.totalorder %s391_s11, 4   ;;  %s468_s6 = smov %s349_s7 }
  0xe3   : > { %s469_s7 = smov %s353_s8  ;;  %s470_s8 = smov %s401_s14 }
  0xe4   : > { %s471_s9 = smov %s391_s11  ;;  %13 = sbr.rel (!%p11_p7) target bundleno = 3 (0x3), region = 64 }
  0xe9   :  { %195 = vsyncpa [#allocation3], 1 }
  0xea   :  { %197 = vsyncpa [#allocation3 + $0x1], 1 }

</bundles_post_ra>
